<compile_context>
chip_gen: v7x
topology: tpu7x:2x2x1
jax: 0.10.0
libtpu: 0.0.40
codegen_flags: <defaults>
</compile_context>

<pallas_src>
import jax
import jax.numpy as jnp
from jax.experimental import pallas as pl
from jax.experimental.pallas import tpu as pltpu


def _round_up(n, m):
    return ((n + m - 1) // m) * m


def encoder_kernel(x_ref, w1_ref, b1_ref, w2_ref, b2_ref, wh_ref, bh_ref, heads_ref):
    # fc1 layer 0: Linear (with folded BN) -> ReLU   (Dropout == identity in eval)
    h = jnp.dot(x_ref[...], w1_ref[...], preferred_element_type=jnp.float32)
    h = jnp.maximum(h + b1_ref[...], 0.0)
    # fc1 layer 1
    h = jnp.dot(h, w2_ref[...], preferred_element_type=jnp.float32)
    h = jnp.maximum(h + b2_ref[...], 0.0)
    # fused heads: [fc_means | fc_logvar] in one matmul, one contiguous store
    heads_ref[...] = (
        jnp.dot(h, wh_ref[...], preferred_element_type=jnp.float32) + bh_ref[...]
    )


def _choose_batch_tiling(B, tile_b):
    """Pick (tile_rows, padded_rows, n_steps) for the batch grid axis."""
    b8 = _round_up(B, 8)
    # At least 2 grid steps once the batch allows it, so the "parallel" axis can
    # shard across both TensorCores on v7x; otherwise exactly enough steps.
    min_steps = 2 if b8 >= 16 else 1
    n_steps = max(min_steps, pl.cdiv(b8, tile_b))
    tb = _round_up(pl.cdiv(b8, n_steps), 8)          # sublane-aligned tile
    return tb, tb * n_steps, n_steps


def encoder_forward(x, params, *, tile_b=2048):
    """Fused Encoder forward. Returns (mean, logvar, latent); latent == mean (eval)."""
    # ---- host-side folding: BN running stats into Linear, heads concatenated ----
    w1 = params["w1"] * params["s1"]
    b1 = params["b1"] * params["s1"] + params["t1"]
    w2 = params["w2"] * params["s2"]
    b2 = params["b2"] * params["s2"] + params["t2"]
    wh = jnp.concatenate([params["wm"], params["wl"]], axis=1)
    bh = jnp.concatenate([params["bm"], params["bl"]], axis=1)

    d_in, h1 = w1.shape
    h2 = w2.shape[1]
    two_z = wh.shape[1]
    z_dim = params["wm"].shape[1]

    # ---- batch tiling (only the batch dim is ever padded) -----------------------
    B = x.shape[0]
    tb, B_p, n_steps = _choose_batch_tiling(B, tile_b)
    xp = jnp.pad(x, ((0, B_p - B), (0, 0))) if B_p != B else x

    def resident(shape):
        # whole-array block, constant index_map -> DMA'd once, stays VMEM-resident
        return pl.BlockSpec(shape, lambda i: (0, 0))

    heads = pl.pallas_call(
        encoder_kernel,
        out_shape=jax.ShapeDtypeStruct((B_p, two_z), jnp.float32),
        grid=(n_steps,),
        in_specs=[
            pl.BlockSpec((tb, d_in), lambda i: (i, 0)),   # streamed x tile (pipelined)
            resident((d_in, h1)), resident((1, h1)),      # layer 0 (BN folded)
            resident((h1, h2)), resident((1, h2)),        # layer 1 (BN folded)
            resident((h2, two_z)), resident((1, two_z)),  # fused heads
        ],
        out_specs=pl.BlockSpec((tb, two_z), lambda i: (i, 0)),
        compiler_params=pltpu.CompilerParams(
            dimension_semantics=("parallel",)),           # megacore sharding on v7x
    )(xp, w1, b1, w2, b2, wh, bh)

    heads = heads[:B]
    mean_x = heads[:, :z_dim]
    logvar_x = heads[:, z_dim:]
    return mean_x, logvar_x, mean_x        # eval-mode reparametrize -> means


def init_params(key, layer, z_dim):
    """Deterministic synthetic parameters. Linear weights stored as [in, out]."""
    d_in, d_h1, d_h2 = layer
    keys = jax.random.split(key, 16)

    def lin(kw, kb, n_in, n_out):
        w = jax.random.normal(kw, (n_in, n_out), jnp.float32) * 0.1
        b = jax.random.normal(kb, (1, n_out), jnp.float32) * 0.05
        return w, b

    def bn_fold(kg, kb, km, kv, n, eps=0.001):
        gamma = 1.0 + 0.1 * jax.random.normal(kg, (1, n), jnp.float32)
        beta = 0.1 * jax.random.normal(kb, (1, n), jnp.float32)
        run_mean = 0.1 * jax.random.normal(km, (1, n), jnp.float32)
        run_var = jnp.abs(1.0 + 0.1 * jax.random.normal(kv, (1, n), jnp.float32))
        scale = gamma * jax.lax.rsqrt(run_var + eps)
        shift = beta - run_mean * scale
        return scale, shift

    w1, b1 = lin(keys[0], keys[1], d_in, d_h1)
    s1, t1 = bn_fold(keys[2], keys[3], keys[4], keys[5], d_h1)
    w2, b2 = lin(keys[6], keys[7], d_h1, d_h2)
    s2, t2 = bn_fold(keys[8], keys[9], keys[10], keys[11], d_h2)
    wm, bm = lin(keys[12], keys[13], d_h2, z_dim)
    wl, bl = lin(keys[14], keys[15], d_h2, z_dim)

    return dict(w1=w1, b1=b1, s1=s1, t1=t1,
                w2=w2, b2=b2, s2=s2, t2=t2,
                wm=wm, bm=bm, wl=wl, bl=bl)


def encoder_ref(x, p):
    """Pure-JAX reference (eval-mode PyTorch semantics, un-folded BN)."""
    h = jnp.maximum((x @ p["w1"] + p["b1"]) * p["s1"] + p["t1"], 0.0)
    h = jnp.maximum((h @ p["w2"] + p["b2"]) * p["s2"] + p["t2"], 0.0)
    mean_x = h @ p["wm"] + p["bm"]
    logvar_x = h @ p["wl"] + p["bl"]
    return mean_x, logvar_x, mean_x


if __name__ == "__main__":
    # Encoder(layer=[16, 32, 32], hidden=32, Z_DIMS=8)
    layer = (16, 32, 32)
    z_dim = 8
    batch = 64          # small, but >=16 so the grid has 2 steps (exercises pipeline)

    key = jax.random.PRNGKey(0)
    kx, kp = jax.random.split(key)
    x = jax.random.normal(kx, (batch, layer[0]), jnp.float32)
    params = init_params(kp, layer, z_dim)

    mean_x, logvar_x, latent = encoder_forward(x, params)
    jax.block_until_ready((mean_x, logvar_x, latent))

    # correctness check against pure-JAX reference (BN not folded there)
    r_mean, r_logvar, r_latent = encoder_ref(x, params)
    assert mean_x.shape == (batch, z_dim) and logvar_x.shape == (batch, z_dim)
    assert jnp.allclose(mean_x, r_mean, atol=1e-5, rtol=1e-4)
    assert jnp.allclose(logvar_x, r_logvar, atol=1e-5, rtol=1e-4)
    assert jnp.allclose(latent, r_latent, atol=1e-5, rtol=1e-4)

    print("KERNEL_OK")
</pallas_src>

<mosaic_0001>
module attributes {stable_mosaic.version = 11 : i64} {
  func.func @encoder_kernel(%arg0: i32, %arg1: memref<32x16xf32, #tpu.memory_space<vmem>>, %arg2: memref<16x32xf32, #tpu.memory_space<vmem>>, %arg3: memref<1x32xf32, #tpu.memory_space<vmem>>, %arg4: memref<32x32xf32, #tpu.memory_space<vmem>>, %arg5: memref<1x32xf32, #tpu.memory_space<vmem>>, %arg6: memref<32x16xf32, #tpu.memory_space<vmem>>, %arg7: memref<1x16xf32, #tpu.memory_space<vmem>>, %arg8: memref<32x16xf32, #tpu.memory_space<vmem>>) attributes {dimension_semantics = [#tpu.dimension_semantics<parallel>], iteration_bounds = array<i64: 2>, scalar_prefetch = 0 : i64, scratch_operands = 0 : i64, tpu.core_type = #tpu.core_type<tc>, window_params = [{transform_indices = @transform_0, window_bounds = array<i64: 32, 16>}, {pipeline_mode = #tpu.pipeline_mode<synchronous>, transform_indices = @transform_1, window_bounds = array<i64: 16, 32>}, {pipeline_mode = #tpu.pipeline_mode<synchronous>, transform_indices = @transform_2, window_bounds = array<i64: 1, 32>}, {pipeline_mode = #tpu.pipeline_mode<synchronous>, transform_indices = @transform_3, window_bounds = array<i64: 32, 32>}, {pipeline_mode = #tpu.pipeline_mode<synchronous>, transform_indices = @transform_4, window_bounds = array<i64: 1, 32>}, {pipeline_mode = #tpu.pipeline_mode<synchronous>, transform_indices = @transform_5, window_bounds = array<i64: 32, 16>}, {pipeline_mode = #tpu.pipeline_mode<synchronous>, transform_indices = @transform_6, window_bounds = array<i64: 1, 16>}, {transform_indices = @transform_7, window_bounds = array<i64: 32, 16>}]} {
    %c0 = arith.constant 0 : index
    %c0_0 = arith.constant 0 : index
    %0 = vector.load %arg1[%c0, %c0_0] : memref<32x16xf32, #tpu.memory_space<vmem>>, vector<32x16xf32>
    %c0_1 = arith.constant 0 : index
    %c0_2 = arith.constant 0 : index
    %1 = vector.load %arg2[%c0_1, %c0_2] : memref<16x32xf32, #tpu.memory_space<vmem>>, vector<16x32xf32>
    %cst = arith.constant dense<0.000000e+00> : vector<32x32xf32>
    %2 = tpu.matmul %0, %1, %cst {dimension_numbers = #tpu.dot_dimension_numbers<[1], [0], [0], [1], [0, 0, 1, 1], [], []>} : vector<32x16xf32>, vector<16x32xf32>, vector<32x32xf32> -> vector<32x32xf32>
    %c0_3 = arith.constant 0 : index
    %c0_4 = arith.constant 0 : index
    %3 = vector.load %arg3[%c0_3, %c0_4] : memref<1x32xf32, #tpu.memory_space<vmem>>, vector<1x32xf32>
    %4 = vector.broadcast %3 : vector<1x32xf32> to vector<32x32xf32>
    %5 = arith.addf %2, %4 : vector<32x32xf32>
    %cst_5 = arith.constant 0.000000e+00 : f32
    %6 = vector.broadcast %cst_5 : f32 to vector<32x32xf32>
    %7 = arith.maximumf %5, %6 : vector<32x32xf32>
    %c0_6 = arith.constant 0 : index
    %c0_7 = arith.constant 0 : index
    %8 = vector.load %arg4[%c0_6, %c0_7] : memref<32x32xf32, #tpu.memory_space<vmem>>, vector<32x32xf32>
    %cst_8 = arith.constant dense<0.000000e+00> : vector<32x32xf32>
    %9 = tpu.matmul %7, %8, %cst_8 {dimension_numbers = #tpu.dot_dimension_numbers<[1], [0], [0], [1], [0, 0, 1, 1], [], []>} : vector<32x32xf32>, vector<32x32xf32>, vector<32x32xf32> -> vector<32x32xf32>
    %c0_9 = arith.constant 0 : index
    %c0_10 = arith.constant 0 : index
    %10 = vector.load %arg5[%c0_9, %c0_10] : memref<1x32xf32, #tpu.memory_space<vmem>>, vector<1x32xf32>
    %11 = vector.broadcast %10 : vector<1x32xf32> to vector<32x32xf32>
    %12 = arith.addf %9, %11 : vector<32x32xf32>
    %cst_11 = arith.constant 0.000000e+00 : f32
    %13 = vector.broadcast %cst_11 : f32 to vector<32x32xf32>
    %14 = arith.maximumf %12, %13 : vector<32x32xf32>
    %c0_12 = arith.constant 0 : index
    %c0_13 = arith.constant 0 : index
    %15 = vector.load %arg6[%c0_12, %c0_13] : memref<32x16xf32, #tpu.memory_space<vmem>>, vector<32x16xf32>
    %cst_14 = arith.constant dense<0.000000e+00> : vector<32x16xf32>
    %16 = tpu.matmul %14, %15, %cst_14 {dimension_numbers = #tpu.dot_dimension_numbers<[1], [0], [0], [1], [0, 0, 1, 1], [], []>} : vector<32x32xf32>, vector<32x16xf32>, vector<32x16xf32> -> vector<32x16xf32>
    %c0_15 = arith.constant 0 : index
    %c0_16 = arith.constant 0 : index
    %17 = vector.load %arg7[%c0_15, %c0_16] : memref<1x16xf32, #tpu.memory_space<vmem>>, vector<1x16xf32>
    %18 = vector.broadcast %17 : vector<1x16xf32> to vector<32x16xf32>
    %19 = arith.addf %16, %18 : vector<32x16xf32>
    %c0_17 = arith.constant 0 : index
    %c0_18 = arith.constant 0 : index
    %20 = vector.load %arg8[%c0_17, %c0_18] : memref<32x16xf32, #tpu.memory_space<vmem>>, vector<32x16xf32>
    tpu.vector_store %arg8[%c0_17, %c0_18], %19 {strides = array<i32>} : memref<32x16xf32, #tpu.memory_space<vmem>>, vector<32x16xf32>,
    return
  }
  func.func @transform_0(%arg0: i32) -> (i32, i32) {
    %c0_i32 = arith.constant 0 : i32
    %c0_i32_0 = arith.constant 0 : i32
    return %arg0, %c0_i32 : i32, i32
  }
  func.func @transform_1(%arg0: i32) -> (i32, i32) {
    %c0_i32 = arith.constant 0 : i32
    %c0_i32_0 = arith.constant 0 : i32
    %c0_i32_1 = arith.constant 0 : i32
    return %c0_i32, %c0_i32_0 : i32, i32
  }
  func.func @transform_2(%arg0: i32) -> (i32, i32) {
    %c0_i32 = arith.constant 0 : i32
    %c0_i32_0 = arith.constant 0 : i32
    %c0_i32_1 = arith.constant 0 : i32
    return %c0_i32, %c0_i32_0 : i32, i32
  }
  func.func @transform_3(%arg0: i32) -> (i32, i32) {
    %c0_i32 = arith.constant 0 : i32
    %c0_i32_0 = arith.constant 0 : i32
    %c0_i32_1 = arith.constant 0 : i32
    return %c0_i32, %c0_i32_0 : i32, i32
  }
  func.func @transform_4(%arg0: i32) -> (i32, i32) {
    %c0_i32 = arith.constant 0 : i32
    %c0_i32_0 = arith.constant 0 : i32
    %c0_i32_1 = arith.constant 0 : i32
    return %c0_i32, %c0_i32_0 : i32, i32
  }
  func.func @transform_5(%arg0: i32) -> (i32, i32) {
    %c0_i32 = arith.constant 0 : i32
    %c0_i32_0 = arith.constant 0 : i32
    %c0_i32_1 = arith.constant 0 : i32
    return %c0_i32, %c0_i32_0 : i32, i32
  }
  func.func @transform_6(%arg0: i32) -> (i32, i32) {
    %c0_i32 = arith.constant 0 : i32
    %c0_i32_0 = arith.constant 0 : i32
    %c0_i32_1 = arith.constant 0 : i32
    return %c0_i32, %c0_i32_0 : i32, i32
  }
  func.func @transform_7(%arg0: i32) -> (i32, i32) {
    %c0_i32 = arith.constant 0 : i32
    %c0_i32_0 = arith.constant 0 : i32
    return %arg0, %c0_i32 : i32, i32
  }
}

</mosaic_0001>

<bundles_post_ra>
// kernel: tpu_custom_call.1
= control target key start
LH: loop header
LB: loop body
LE: loop exit
PB: predicated region body
PF: predicated region fallthrough
CT: control target
= control target key end

     0   :  { %s840_s24 = smov 0   ;;  %s919_s0 = inlined_call_operand.vmem [shape: f32[64,16], index: 0, kind: input, shape index: {}]   ;;  %s920_s1 = inlined_call_operand.vmem [shape: f32[16,32], index: 1, kind: input, shape index: {}]   ;;  %s921_s2 = inlined_call_operand.vmem [shape: f32[1,32], index: 2, kind: input, shape index: {}]   ;;  %s922_s3 = inlined_call_operand.vmem [shape: f32[32,32], index: 3, kind: input, shape index: {}]   ;;  %s923_s4 = inlined_call_operand.vmem [shape: f32[1,32], index: 4, kind: input, shape index: {}]   ;;  %s924_s5 = inlined_call_operand.vmem [shape: f32[32,16], index: 5, kind: input, shape index: {}]   ;;  %s925_s6 = inlined_call_operand.vmem [shape: f32[1,16], index: 6, kind: input, shape index: {}]   ;;  %s926_s7 = inlined_call_operand.vmem [shape: f32[64,16], index: 7, kind: output, shape index: {}]  }
   0x1 LB: > { %s678_s25 = sadd.s32 4294967295, %s798_s24   ;;  %p682_p0 = scmp.ge.s32.totalorder %s798_s24, 1  ;;  %s798_s24 = sphi %s840_s24, %s17_s24  }
   0x2   : > { %p238_p1 = scmp.lt.s32.totalorder %s798_s24, 3 }
   0x4   : > { %p239_p2 = pnand %p682_p0, %p238_p1 }
   0x5   : > { %v286_v0 = vld [vmem:[%s920_s1] sm:$0xff] (!%p239_p2)  ;;  %v287_v1 = vld [vmem:[%s920_s1 + $0x8] sm:$0xff] (!%p239_p2)  ;;  %s683_s30 = sshll.u32 (!%p239_p2), %s678_s25, 2  ;;  %vm295_vm0 = vcmask (!%p239_p2), 130048   ;;  %v399_v10 = vld [vmem:[%s922_s3 + $0x10] sm:$0xff] (!%p239_p2)  ;;  %vm408_vm1 = vcmask (!%p239_p2), 261120  }
   0x6   : > { %242 = sbr.rel (%p239_p2) target bundleno = 674 (0x2a2), region = 48  ;;  %v397_v2 = vld [vmem:[%s922_s3] sm:$0xff] (!%p239_p2)  ;;  %v764_v3 = vpack.c.bf16 (!%p239_p2), %v287_v1, %v286_v0  ;;  %p271_p3 = scmp.lt.s32.totalorder (!%p239_p2), %s683_s30, 7  ;;  %v398_v4 = vld [vmem:[%s922_s3 + $0x8] sm:$0xff] (!%p239_p2)  ;;  %v400_v11 = vld [vmem:[%s922_s3 + $0x18] sm:$0xff] (!%p239_p2) }
   0x7   : > { %v768_v5 = vpack.c.bf16 (!%p239_p2), %v398_v4, %v397_v2  ;;  %v772_v12 = vpack.c.bf16 (!%p239_p2), %v400_v11, %v399_v10  ;;  %v510_v13 = vld [vmem:[%s924_s5] sm:$0xff] (!%p239_p2)  ;;  %v511_v14 = vld [vmem:[%s924_s5 + $0x8] sm:$0xff] (!%p239_p2)  ;;  %v512_v29 = vld [vmem:[%s924_s5 + $0x10] sm:$0xff] (!%p239_p2) }
   0x8   : > { %765 = vmatprep.subr.bf16.mxu0 (!%p239_p2), %v764_v3  ;;  %v776_v15 = vpack.c.bf16 (!%p239_p2), %v511_v14, %v510_v13  ;;  %v687_v16 = vld [vmem:[%s921_s2] ss:$0 sm:$0xff] (!%p239_p2)  ;;  %v513_v30 = vld [vmem:[%s924_s5 + $0x18] sm:$0xff] (!%p239_p2) }
   0x9   : > { %767 = vmatpush3.bf16.msra.mxu0 (!%p239_p2), %v764_v3  ;;  %769 = vmatprep.subr.bf16.mxu1 (!%p239_p2), %v768_v5  ;;  %v780_v31 = vpack.c.bf16 (!%p239_p2), %v513_v30, %v512_v29  ;;  %v692_v32 = vld [vmem:[%s923_s4] ss:$0 sm:$0xff] (!%p239_p2) }
   0xa   : > { %771 = vmatpush3.bf16.msra.mxu1 (!%p239_p2), %v768_v5  ;;  %777 = vmatprep.subr.bf16.mxu0 (!%p239_p2), %v776_v15  ;;  %v697_v45 = vld [vmem:[%s925_s6] ss:$0 sm:$0xff] (!%p239_p2) }
   0xb   : > { %773 = vmatprep.subr.bf16.mxu1 (!%p239_p2), %v772_v12 }
   0xd   : > { %s928_s30 = smov (!%p271_p3, %s683_s30), 7 }
   0xe   : > { %s684_s12 = sshll.u32 %s928_s30, 3  ;;  %775 = vmatpush3.bf16.msra.mxu1 %v772_v12 }
   0xf   : > { %s274_s15 = scalar_lea.vmem %s919_s0, %s684_s12  ;;  %s280_s16 = scalar_lea.vmem %s926_s7, %s684_s12 }
  0x10   : > { %v282_v6 = vld [vmem:[%s274_s15] sm:$0xff]  ;;  %v283_v7 = vld [vmem:[%s274_s15 + $0x8] sm:$0xff]  ;;  %v284_v8 = vld [vmem:[%s274_s15 + $0x10] sm:$0xff] }
  0x11   : > { %730 = vmatprep.mubr.msk.f32.mxu0 %vm295_vm0, %v282_v6  ;;  %v285_v9 = vld [vmem:[%s274_s15 + $0x18] sm:$0xff] }
  0x12   : > { %731 = vmatmul.mubr.msk.f32.vlgmr.msra.gmra.mrb[0].mxu0 %vm295_vm0, %v283_v7 }
  0x13   : > { %733 = vmatprep.mubr.msk.f32.mxu0 %vm295_vm0, %v284_v8  ;;  %779 = vmatpush3.bf16.msra.mxu0 %v776_v15 }
  0x14   : > { %781 = vmatprep.subr.bf16.mxu0 %v780_v31 }
  0x16   : > { %734 = vmatmul.mubr.msk.f32.gmra.mrb[2].mxu0 %vm295_vm0, %v285_v9 }
  0x17   : > { %783 = vmatpush3.bf16.msra.mxu0 %v780_v31 }
  0xe5   : > { %v732_v17 = vpop.f32.mrb[0].mxu0 }
  0xe6   : > { %v380_v18 = vadd.f32 %v732_v17, %v687_v16  ;;  %v374_v19 = vpop.f32.mrb[1].mxu0 }
  0xe7   : > { %v375_v20 = vadd.f32 %v687_v16, %v374_v19 }
  0xe8   : > { %v394_v23 = vmax.f32 %v380_v18, 0.0 }
  0xe9   : > { %v393_v21 = vmax.f32 %v375_v20, 0.0  ;;  %v735_v22 = vpop.f32.mrb[2].mxu0 }
  0xea   : > { %v390_v24 = vadd.f32 %v735_v22, %v687_v16  ;;  %v384_v25 = vpop.f32.mrb[3].mxu0 }
  0xeb   : > { %v385_v26 = vadd.f32 %v687_v16, %v384_v25  ;;  %744 = vmatprep.mubr.msk.f32.mxu1 %vm408_vm1, %v393_v21 }
  0xec   : > { %745 = vmatmul.mubr.msk.f32.vlgmr.msra.gmra.mrb[0].mxu1 %vm408_vm1, %v394_v23  ;;  %v396_v28 = vmax.f32 %v390_v24, 0.0 }
  0xed   : > { %v395_v27 = vmax.f32 %v385_v26, 0.0 }
  0xef   : > { %747 = vmatprep.mubr.msk.f32.mxu1 %vm408_vm1, %v395_v27 }
  0xf0   : > { %748 = vmatmul.mubr.msk.f32.gmra.mrb[2].mxu1 %vm408_vm1, %v396_v28 }
 0x1bf   : > { %v746_v33 = vpop.f32.mrb[0].mxu1 }
 0x1c0   : > { %v493_v34 = vadd.f32 %v746_v33, %v692_v32  ;;  %v487_v35 = vpop.f32.mrb[1].mxu1 }
 0x1c1   : > { %v488_v36 = vadd.f32 %v692_v32, %v487_v35 }
 0x1c2   : > { %v507_v39 = vmax.f32 %v493_v34, 0.0 }
 0x1c3   : > { %v506_v37 = vmax.f32 %v488_v36, 0.0  ;;  %v749_v38 = vpop.f32.mrb[2].mxu1 }
 0x1c4   : > { %v503_v40 = vadd.f32 %v749_v38, %v692_v32  ;;  %v497_v41 = vpop.f32.mrb[3].mxu1 }
 0x1c5   : > { %v498_v42 = vadd.f32 %v692_v32, %v497_v41  ;;  %758 = vmatprep.mubr.msk.f32.mxu0 %vm408_vm1, %v506_v37 }
 0x1c6   : > { %759 = vmatmul.mubr.msk.f32.vlgmr.msra.gmra.mrb[4].mxu0 %vm408_vm1, %v507_v39  ;;  %v509_v44 = vmax.f32 %v503_v40, 0.0 }
 0x1c7   : > { %v508_v43 = vmax.f32 %v498_v42, 0.0 }
 0x1c9   : > { %761 = vmatprep.mubr.msk.f32.mxu0 %vm408_vm1, %v508_v43 }
 0x1ca   : > { %762 = vmatmul.mubr.msk.f32.gmra.mrb[6].mxu0 %vm408_vm1, %v509_v44 }
 0x299   : > { %v760_v46 = vpop.f32.mrb[4].mxu0 }
 0x29a   : > { %v599_v47 = vpop.f32.mrb[5].mxu0  ;;  %v605_v49 = vadd.f32 %v760_v46, %v697_v45 }
 0x29b   : > { %v600_v48 = vadd.f32 %v697_v45, %v599_v47 }
 0x29c   : > { %619 = vst.msk [vmem:[%s280_s16 + $0x8] sm:$0xff] %vm295_vm0, %v605_v49 }
 0x29d   : > { %618 = vst.msk [vmem:[%s280_s16] sm:$0xff] %vm295_vm0, %v600_v48  ;;  %v763_v50 = vpop.f32.mrb[6].mxu0 }
 0x29e   : > { %v609_v51 = vpop.f32.mrb[7].mxu0  ;;  %v615_v53 = vadd.f32 %v763_v50, %v697_v45 }
 0x29f   : > { %v610_v52 = vadd.f32 %v697_v45, %v609_v51 }
 0x2a0   : > { %621 = vst.msk [vmem:[%s280_s16 + $0x18] sm:$0xff] %vm295_vm0, %v615_v53 }
 0x2a1   : > { %620 = vst.msk [vmem:[%s280_s16 + $0x10] sm:$0xff] %vm295_vm0, %v610_v52 }
 0x2a2 PF: > { %s17_s24 = sadd.s32 1, %s798_s24  }
 0x2a3   : > { %p14_p4 = scmp.ge.s32.totalorder %s17_s24, 4  }
 0x2a5   :  { %16 = sbr.rel (!%p14_p4) target bundleno = 1 (0x1), region = 78 }

</bundles_post_ra>
